<compile_context>
chip_gen: v5e
topology: v5e:2x2
jax: 0.10.0
libtpu: 0.0.40
codegen_flags: <defaults>
</compile_context>

<pallas_src>
import functools

import jax
import jax.numpy as jnp
from jax.experimental import pallas as pl
from jax.experimental.pallas import tpu as pltpu

# SELU constants (match torch.nn.SELU)
_SELU_ALPHA = 1.6732632423543772
_SELU_SCALE = 1.0507009873554805


def _round_up(x, m):
    return ((x + m - 1) // m) * m


def _cdiv(a, b):
    return (a + b - 1) // b


def _selu(x):
    # Computed in f32 (v5e VPU/EUP have no bf16 elementwise); exp goes to EUP.
    return _SELU_SCALE * jnp.where(x > 0, x, _SELU_ALPHA * (jnp.exp(x) - 1.0))


def _mlp_kernel(n_hidden_blocks, x_ref, w0_ref, b0_ref, wh_ref, bh_ref,
                wo_ref, bo_ref, o_ref):
    # Cast the f32 input tile to bf16 in-kernel (no extra wrapper HBM pass).
    x = x_ref[...].astype(jnp.bfloat16)

    # First Linear(feature_count -> units) + SELU (AlphaDropout == identity in eval).
    h = jnp.dot(x, w0_ref[...], preferred_element_type=jnp.float32)
    h = _selu(h + b0_ref[...])

    # Hidden Linear(units -> units) + SELU, statically unrolled so the LLO
    # scheduler can overlap the per-layer exp (EUP) with the next vmatmul push.
    for l in range(n_hidden_blocks):
        h = jnp.dot(h.astype(jnp.bfloat16), wh_ref[l],
                    preferred_element_type=jnp.float32)
        h = _selu(h + bh_ref[l])

    # Final Linear(units -> n_classes); store unpadded f32 (contiguous HBM rows).
    y = jnp.dot(h.astype(jnp.bfloat16), wo_ref[...],
                preferred_element_type=jnp.float32)
    o_ref[...] = y + bo_ref[...]


def cough_net_linear_forward(x, params, *, layers=5, tile_m=1024):
    """Run the fused MLP kernel. x: [batch, feature_count] float32."""
    w0, b0, wh, bh, wo, bo = params
    batch, feature_count = x.shape
    units = w0.shape[1]
    n_classes = wo.shape[1]
    n_hidden_blocks = layers - 1

    # ---- balanced batch tiling (no wrapper-side padding of x) ----------------
    padded_rows = _round_up(batch, 8)
    n_tiles = _cdiv(padded_rows, tile_m)
    if n_tiles < 2 and padded_rows >= 16:
        n_tiles = 2                       # v7x: keep both TensorCores busy
    tm = _round_up(_cdiv(padded_rows, n_tiles), 8)
    grid = (_cdiv(batch, tm),)            # ragged last tile handled by Pallas

    # ---- dtype prep: bf16 weights into the MXU, f32 biases/accumulation ------
    w0_b = w0.astype(jnp.bfloat16)
    wh_b = wh.astype(jnp.bfloat16)
    wo_b = wo.astype(jnp.bfloat16)

    kernel = functools.partial(_mlp_kernel, n_hidden_blocks)

    const = lambda i: (0, 0)              # weights/biases: resident, DMA'd once
    const3 = lambda i: (0, 0, 0)

    flops = 2 * batch * (feature_count * units
                         + n_hidden_blocks * units * units
                         + units * n_classes)
    bytes_accessed = (batch * feature_count * 4          # x read (f32)
                      + batch * n_classes * 4            # out write (f32)
                      + (w0_b.size + wh_b.size + wo_b.size) * 2
                      + (b0.size + bh.size + bo.size) * 4)
    cost = pl.CostEstimate(flops=flops,
                           transcendentals=layers * batch * units,
                           bytes_accessed=bytes_accessed)

    out = pl.pallas_call(
        kernel,
        out_shape=jax.ShapeDtypeStruct((batch, n_classes), jnp.float32),
        grid=grid,
        in_specs=[
            pl.BlockSpec((tm, feature_count), lambda i: (i, 0)),        # x (f32)
            pl.BlockSpec((feature_count, units), const),                # w0
            pl.BlockSpec((1, units), const),                            # b0
            pl.BlockSpec((n_hidden_blocks, units, units), const3),      # wh
            pl.BlockSpec((n_hidden_blocks, 1, units), const3),          # bh
            pl.BlockSpec((units, n_classes), const),                    # wo
            pl.BlockSpec((1, n_classes), const),                        # bo
        ],
        out_specs=pl.BlockSpec((tm, n_classes), lambda i: (i, 0)),
        compiler_params=pltpu.CompilerParams(
            dimension_semantics=("parallel",),
        ),
        cost_estimate=cost,
    )(x, w0_b, b0, wh_b, bh, wo_b, bo)

    return out


def init_params(key, feature_count, n_classes, units=64, layers=5):
    """Deterministic init mimicking torch.nn.Linear (uniform +-1/sqrt(fan_in))."""
    ks = jax.random.split(key, 6)

    def lin_init(kw, kb, fan_in, fan_out):
        bound = 1.0 / jnp.sqrt(fan_in)
        w = jax.random.uniform(kw, (fan_in, fan_out), jnp.float32, -bound, bound)
        b = jax.random.uniform(kb, (1, fan_out), jnp.float32, -bound, bound)
        return w, b

    w0, b0 = lin_init(ks[0], ks[1], feature_count, units)

    n_hidden = layers - 1
    bound = 1.0 / jnp.sqrt(units)
    wh = jax.random.uniform(ks[2], (n_hidden, units, units), jnp.float32, -bound, bound)
    bh = jax.random.uniform(ks[3], (n_hidden, 1, units), jnp.float32, -bound, bound)

    wo, bo = lin_init(ks[4], ks[5], units, n_classes)
    return w0, b0, wh, bh, wo, bo


def reference_forward(x, params, *, layers=5):
    """Pure-JAX reference with the same bf16-operand / f32-accumulate semantics."""
    w0, b0, wh, bh, wo, bo = params
    h = jnp.dot(x.astype(jnp.bfloat16), w0.astype(jnp.bfloat16),
                preferred_element_type=jnp.float32)
    h = _selu(h + b0)
    for l in range(layers - 1):
        h = jnp.dot(h.astype(jnp.bfloat16), wh[l].astype(jnp.bfloat16),
                    preferred_element_type=jnp.float32)
        h = _selu(h + bh[l])
    y = jnp.dot(h.astype(jnp.bfloat16), wo.astype(jnp.bfloat16),
                preferred_element_type=jnp.float32)
    return y + bo


if __name__ == "__main__":
    # Small shapes consistent with the module: feature-vector inputs.
    batch = 8
    feature_count = 32
    n_classes = 4
    units = 64
    layers = 5

    key = jax.random.PRNGKey(0)
    k_x, k_p = jax.random.split(key)

    x = jax.random.normal(k_x, (batch, feature_count), dtype=jnp.float32)
    params = init_params(k_p, feature_count, n_classes, units=units, layers=layers)

    # TODO(synk): AlphaDropout has stochastic train-mode behavior; here it is
    # the identity (inference semantics), matching model.eval().

    y = cough_net_linear_forward(x, params, layers=layers)
    y = jax.block_until_ready(y)

    y_ref = reference_forward(x, params, layers=layers)
    assert y.shape == (batch, n_classes)
    assert jnp.allclose(y, y_ref, atol=2e-3, rtol=2e-3), "mismatch vs reference"

    print("KERNEL_OK")
</pallas_src>

<mosaic_0001>
module attributes {stable_mosaic.version = 11 : i64} {
  func.func @_mlp_kernel(%arg0: i32, %arg1: memref<8x32xf32, #tpu.memory_space<vmem>>, %arg2: memref<32x64xbf16, #tpu.memory_space<vmem>>, %arg3: memref<1x64xf32, #tpu.memory_space<vmem>>, %arg4: memref<4x64x64xbf16, #tpu.memory_space<vmem>>, %arg5: memref<4x1x64xf32, #tpu.memory_space<vmem>>, %arg6: memref<64x4xbf16, #tpu.memory_space<vmem>>, %arg7: memref<1x4xf32, #tpu.memory_space<vmem>>, %arg8: memref<8x4xf32, #tpu.memory_space<vmem>>) attributes {dimension_semantics = [#tpu.dimension_semantics<parallel>], iteration_bounds = array<i64: 1>, scalar_prefetch = 0 : i64, scratch_operands = 0 : i64, tpu.core_type = #tpu.core_type<tc>, window_params = [{transform_indices = @transform_0, window_bounds = array<i64: 8, 32>}, {pipeline_mode = #tpu.pipeline_mode<synchronous>, transform_indices = @transform_1, window_bounds = array<i64: 32, 64>}, {pipeline_mode = #tpu.pipeline_mode<synchronous>, transform_indices = @transform_2, window_bounds = array<i64: 1, 64>}, {pipeline_mode = #tpu.pipeline_mode<synchronous>, transform_indices = @transform_3, window_bounds = array<i64: 4, 64, 64>}, {pipeline_mode = #tpu.pipeline_mode<synchronous>, transform_indices = @transform_4, window_bounds = array<i64: 4, 1, 64>}, {pipeline_mode = #tpu.pipeline_mode<synchronous>, transform_indices = @transform_5, window_bounds = array<i64: 64, 4>}, {pipeline_mode = #tpu.pipeline_mode<synchronous>, transform_indices = @transform_6, window_bounds = array<i64: 1, 4>}, {transform_indices = @transform_7, window_bounds = array<i64: 8, 4>}]} {
    %c0 = arith.constant 0 : index
    %c0_0 = arith.constant 0 : index
    %0 = vector.load %arg1[%c0, %c0_0] : memref<8x32xf32, #tpu.memory_space<vmem>>, vector<8x32xf32>
    %1 = arith.truncf %0 : vector<8x32xf32> to vector<8x32xbf16>
    %c0_1 = arith.constant 0 : index
    %c0_2 = arith.constant 0 : index
    %2 = vector.load %arg2[%c0_1, %c0_2] : memref<32x64xbf16, #tpu.memory_space<vmem>>, vector<32x64xbf16>
    %cst = arith.constant dense<0.000000e+00> : vector<8x64xf32>
    %3 = tpu.matmul %1, %2, %cst {dimension_numbers = #tpu.dot_dimension_numbers<[1], [0], [0], [1], [0, 0, 1, 1], [], []>} : vector<8x32xbf16>, vector<32x64xbf16>, vector<8x64xf32> -> vector<8x64xf32>
    %c0_3 = arith.constant 0 : index
    %c0_4 = arith.constant 0 : index
    %4 = vector.load %arg3[%c0_3, %c0_4] : memref<1x64xf32, #tpu.memory_space<vmem>>, vector<1x64xf32>
    %5 = vector.broadcast %4 : vector<1x64xf32> to vector<8x64xf32>
    %6 = arith.addf %3, %5 : vector<8x64xf32>
    %cst_5 = arith.constant 0.000000e+00 : f32
    %7 = vector.broadcast %cst_5 : f32 to vector<8x64xf32>
    %8 = arith.cmpf ogt, %6, %7 : vector<8x64xf32>
    %9 = math.exp %6 : vector<8x64xf32>
    %cst_6 = arith.constant 1.000000e+00 : f32
    %10 = vector.broadcast %cst_6 : f32 to vector<8x64xf32>
    %11 = arith.subf %9, %10 : vector<8x64xf32>
    %cst_7 = arith.constant 1.67326319 : f32
    %12 = vector.broadcast %cst_7 : f32 to vector<8x64xf32>
    %13 = arith.mulf %12, %11 : vector<8x64xf32>
    %14 = arith.select %8, %6, %13 : vector<8x64xi1>, vector<8x64xf32>
    %cst_8 = arith.constant 1.05070102 : f32
    %15 = vector.broadcast %cst_8 : f32 to vector<8x64xf32>
    %16 = arith.mulf %15, %14 : vector<8x64xf32>
    %17 = arith.truncf %16 : vector<8x64xf32> to vector<8x64xbf16>
    %c0_9 = arith.constant 0 : index
    %c0_10 = arith.constant 0 : index
    %c0_11 = arith.constant 0 : index
    %18 = vector.load %arg4[%c0_9, %c0_10, %c0_11] : memref<4x64x64xbf16, #tpu.memory_space<vmem>>, vector<1x64x64xbf16>
    %19 = vector.shape_cast %18 : vector<1x64x64xbf16> to vector<64x64xbf16>
    %cst_12 = arith.constant dense<0.000000e+00> : vector<8x64xf32>
    %20 = tpu.matmul %17, %19, %cst_12 {dimension_numbers = #tpu.dot_dimension_numbers<[1], [0], [0], [1], [0, 0, 1, 1], [], []>} : vector<8x64xbf16>, vector<64x64xbf16>, vector<8x64xf32> -> vector<8x64xf32>
    %c0_13 = arith.constant 0 : index
    %c0_14 = arith.constant 0 : index
    %c0_15 = arith.constant 0 : index
    %21 = vector.load %arg5[%c0_13, %c0_14, %c0_15] : memref<4x1x64xf32, #tpu.memory_space<vmem>>, vector<1x1x64xf32>
    %22 = vector.shape_cast %21 : vector<1x1x64xf32> to vector<1x64xf32>
    %23 = vector.broadcast %22 : vector<1x64xf32> to vector<8x64xf32>
    %24 = arith.addf %20, %23 : vector<8x64xf32>
    %cst_16 = arith.constant 0.000000e+00 : f32
    %25 = vector.broadcast %cst_16 : f32 to vector<8x64xf32>
    %26 = arith.cmpf ogt, %24, %25 : vector<8x64xf32>
    %27 = math.exp %24 : vector<8x64xf32>
    %cst_17 = arith.constant 1.000000e+00 : f32
    %28 = vector.broadcast %cst_17 : f32 to vector<8x64xf32>
    %29 = arith.subf %27, %28 : vector<8x64xf32>
    %cst_18 = arith.constant 1.67326319 : f32
    %30 = vector.broadcast %cst_18 : f32 to vector<8x64xf32>
    %31 = arith.mulf %30, %29 : vector<8x64xf32>
    %32 = arith.select %26, %24, %31 : vector<8x64xi1>, vector<8x64xf32>
    %cst_19 = arith.constant 1.05070102 : f32
    %33 = vector.broadcast %cst_19 : f32 to vector<8x64xf32>
    %34 = arith.mulf %33, %32 : vector<8x64xf32>
    %35 = arith.truncf %34 : vector<8x64xf32> to vector<8x64xbf16>
    %c1 = arith.constant 1 : index
    %c0_20 = arith.constant 0 : index
    %c0_21 = arith.constant 0 : index
    %36 = vector.load %arg4[%c1, %c0_20, %c0_21] : memref<4x64x64xbf16, #tpu.memory_space<vmem>>, vector<1x64x64xbf16>
    %37 = vector.shape_cast %36 : vector<1x64x64xbf16> to vector<64x64xbf16>
    %cst_22 = arith.constant dense<0.000000e+00> : vector<8x64xf32>
    %38 = tpu.matmul %35, %37, %cst_22 {dimension_numbers = #tpu.dot_dimension_numbers<[1], [0], [0], [1], [0, 0, 1, 1], [], []>} : vector<8x64xbf16>, vector<64x64xbf16>, vector<8x64xf32> -> vector<8x64xf32>
    %c1_23 = arith.constant 1 : index
    %c0_24 = arith.constant 0 : index
    %c0_25 = arith.constant 0 : index
    %39 = vector.load %arg5[%c1_23, %c0_24, %c0_25] : memref<4x1x64xf32, #tpu.memory_space<vmem>>, vector<1x1x64xf32>
    %40 = vector.shape_cast %39 : vector<1x1x64xf32> to vector<1x64xf32>
    %41 = vector.broadcast %40 : vector<1x64xf32> to vector<8x64xf32>
    %42 = arith.addf %38, %41 : vector<8x64xf32>
    %cst_26 = arith.constant 0.000000e+00 : f32
    %43 = vector.broadcast %cst_26 : f32 to vector<8x64xf32>
    %44 = arith.cmpf ogt, %42, %43 : vector<8x64xf32>
    %45 = math.exp %42 : vector<8x64xf32>
    %cst_27 = arith.constant 1.000000e+00 : f32
    %46 = vector.broadcast %cst_27 : f32 to vector<8x64xf32>
    %47 = arith.subf %45, %46 : vector<8x64xf32>
    %cst_28 = arith.constant 1.67326319 : f32
    %48 = vector.broadcast %cst_28 : f32 to vector<8x64xf32>
    %49 = arith.mulf %48, %47 : vector<8x64xf32>
    %50 = arith.select %44, %42, %49 : vector<8x64xi1>, vector<8x64xf32>
    %cst_29 = arith.constant 1.05070102 : f32
    %51 = vector.broadcast %cst_29 : f32 to vector<8x64xf32>
    %52 = arith.mulf %51, %50 : vector<8x64xf32>
    %53 = arith.truncf %52 : vector<8x64xf32> to vector<8x64xbf16>
    %c2 = arith.constant 2 : index
    %c0_30 = arith.constant 0 : index
    %c0_31 = arith.constant 0 : index
    %54 = vector.load %arg4[%c2, %c0_30, %c0_31] : memref<4x64x64xbf16, #tpu.memory_space<vmem>>, vector<1x64x64xbf16>
    %55 = vector.shape_cast %54 : vector<1x64x64xbf16> to vector<64x64xbf16>
    %cst_32 = arith.constant dense<0.000000e+00> : vector<8x64xf32>
    %56 = tpu.matmul %53, %55, %cst_32 {dimension_numbers = #tpu.dot_dimension_numbers<[1], [0], [0], [1], [0, 0, 1, 1], [], []>} : vector<8x64xbf16>, vector<64x64xbf16>, vector<8x64xf32> -> vector<8x64xf32>
    %c2_33 = arith.constant 2 : index
    %c0_34 = arith.constant 0 : index
    %c0_35 = arith.constant 0 : index
    %57 = vector.load %arg5[%c2_33, %c0_34, %c0_35] : memref<4x1x64xf32, #tpu.memory_space<vmem>>, vector<1x1x64xf32>
    %58 = vector.shape_cast %57 : vector<1x1x64xf32> to vector<1x64xf32>
    %59 = vector.broadcast %58 : vector<1x64xf32> to vector<8x64xf32>
    %60 = arith.addf %56, %59 : vector<8x64xf32>
    %cst_36 = arith.constant 0.000000e+00 : f32
    %61 = vector.broadcast %cst_36 : f32 to vector<8x64xf32>
    %62 = arith.cmpf ogt, %60, %61 : vector<8x64xf32>
    %63 = math.exp %60 : vector<8x64xf32>
    %cst_37 = arith.constant 1.000000e+00 : f32
    %64 = vector.broadcast %cst_37 : f32 to vector<8x64xf32>
    %65 = arith.subf %63, %64 : vector<8x64xf32>
    %cst_38 = arith.constant 1.67326319 : f32
    %66 = vector.broadcast %cst_38 : f32 to vector<8x64xf32>
    %67 = arith.mulf %66, %65 : vector<8x64xf32>
    %68 = arith.select %62, %60, %67 : vector<8x64xi1>, vector<8x64xf32>
    %cst_39 = arith.constant 1.05070102 : f32
    %69 = vector.broadcast %cst_39 : f32 to vector<8x64xf32>
    %70 = arith.mulf %69, %68 : vector<8x64xf32>
    %71 = arith.truncf %70 : vector<8x64xf32> to vector<8x64xbf16>
    %c3 = arith.constant 3 : index
    %c0_40 = arith.constant 0 : index
    %c0_41 = arith.constant 0 : index
    %72 = vector.load %arg4[%c3, %c0_40, %c0_41] : memref<4x64x64xbf16, #tpu.memory_space<vmem>>, vector<1x64x64xbf16>
    %73 = vector.shape_cast %72 : vector<1x64x64xbf16> to vector<64x64xbf16>
    %cst_42 = arith.constant dense<0.000000e+00> : vector<8x64xf32>
    %74 = tpu.matmul %71, %73, %cst_42 {dimension_numbers = #tpu.dot_dimension_numbers<[1], [0], [0], [1], [0, 0, 1, 1], [], []>} : vector<8x64xbf16>, vector<64x64xbf16>, vector<8x64xf32> -> vector<8x64xf32>
    %c3_43 = arith.constant 3 : index
    %c0_44 = arith.constant 0 : index
    %c0_45 = arith.constant 0 : index
    %75 = vector.load %arg5[%c3_43, %c0_44, %c0_45] : memref<4x1x64xf32, #tpu.memory_space<vmem>>, vector<1x1x64xf32>
    %76 = vector.shape_cast %75 : vector<1x1x64xf32> to vector<1x64xf32>
    %77 = vector.broadcast %76 : vector<1x64xf32> to vector<8x64xf32>
    %78 = arith.addf %74, %77 : vector<8x64xf32>
    %cst_46 = arith.constant 0.000000e+00 : f32
    %79 = vector.broadcast %cst_46 : f32 to vector<8x64xf32>
    %80 = arith.cmpf ogt, %78, %79 : vector<8x64xf32>
    %81 = math.exp %78 : vector<8x64xf32>
    %cst_47 = arith.constant 1.000000e+00 : f32
    %82 = vector.broadcast %cst_47 : f32 to vector<8x64xf32>
    %83 = arith.subf %81, %82 : vector<8x64xf32>
    %cst_48 = arith.constant 1.67326319 : f32
    %84 = vector.broadcast %cst_48 : f32 to vector<8x64xf32>
    %85 = arith.mulf %84, %83 : vector<8x64xf32>
    %86 = arith.select %80, %78, %85 : vector<8x64xi1>, vector<8x64xf32>
    %cst_49 = arith.constant 1.05070102 : f32
    %87 = vector.broadcast %cst_49 : f32 to vector<8x64xf32>
    %88 = arith.mulf %87, %86 : vector<8x64xf32>
    %89 = arith.truncf %88 : vector<8x64xf32> to vector<8x64xbf16>
    %c0_50 = arith.constant 0 : index
    %c0_51 = arith.constant 0 : index
    %90 = vector.load %arg6[%c0_50, %c0_51] : memref<64x4xbf16, #tpu.memory_space<vmem>>, vector<64x4xbf16>
    %cst_52 = arith.constant dense<0.000000e+00> : vector<8x4xf32>
    %91 = tpu.matmul %89, %90, %cst_52 {dimension_numbers = #tpu.dot_dimension_numbers<[1], [0], [0], [1], [0, 0, 1, 1], [], []>} : vector<8x64xbf16>, vector<64x4xbf16>, vector<8x4xf32> -> vector<8x4xf32>
    %c0_53 = arith.constant 0 : index
    %c0_54 = arith.constant 0 : index
    %92 = vector.load %arg7[%c0_53, %c0_54] : memref<1x4xf32, #tpu.memory_space<vmem>>, vector<1x4xf32>
    %93 = vector.broadcast %92 : vector<1x4xf32> to vector<8x4xf32>
    %94 = arith.addf %91, %93 : vector<8x4xf32>
    %c0_55 = arith.constant 0 : index
    %c0_56 = arith.constant 0 : index
    %95 = vector.load %arg8[%c0_55, %c0_56] : memref<8x4xf32, #tpu.memory_space<vmem>>, vector<8x4xf32>
    tpu.vector_store %arg8[%c0_55, %c0_56], %94 {strides = array<i32>} : memref<8x4xf32, #tpu.memory_space<vmem>>, vector<8x4xf32>,
    return
  }
  func.func @transform_0(%arg0: i32) -> (i32, i32) {
    %c0_i32 = arith.constant 0 : i32
    %c0_i32_0 = arith.constant 0 : i32
    return %arg0, %c0_i32 : i32, i32
  }
  func.func @transform_1(%arg0: i32) -> (i32, i32) {
    %c0_i32 = arith.constant 0 : i32
    %c0_i32_0 = arith.constant 0 : i32
    %c0_i32_1 = arith.constant 0 : i32
    return %c0_i32, %c0_i32_0 : i32, i32
  }
  func.func @transform_2(%arg0: i32) -> (i32, i32) {
    %c0_i32 = arith.constant 0 : i32
    %c0_i32_0 = arith.constant 0 : i32
    %c0_i32_1 = arith.constant 0 : i32
    return %c0_i32, %c0_i32_0 : i32, i32
  }
  func.func @transform_3(%arg0: i32) -> (i32, i32, i32) {
    %c0_i32 = arith.constant 0 : i32
    %c0_i32_0 = arith.constant 0 : i32
    %c0_i32_1 = arith.constant 0 : i32
    %c0_i32_2 = arith.constant 0 : i32
    return %c0_i32, %c0_i32_0, %c0_i32_1 : i32, i32, i32
  }
  func.func @transform_4(%arg0: i32) -> (i32, i32, i32) {
    %c0_i32 = arith.constant 0 : i32
    %c0_i32_0 = arith.constant 0 : i32
    %c0_i32_1 = arith.constant 0 : i32
    %c0_i32_2 = arith.constant 0 : i32
    return %c0_i32, %c0_i32_0, %c0_i32_1 : i32, i32, i32
  }
  func.func @transform_5(%arg0: i32) -> (i32, i32) {
    %c0_i32 = arith.constant 0 : i32
    %c0_i32_0 = arith.constant 0 : i32
    %c0_i32_1 = arith.constant 0 : i32
    return %c0_i32, %c0_i32_0 : i32, i32
  }
  func.func @transform_6(%arg0: i32) -> (i32, i32) {
    %c0_i32 = arith.constant 0 : i32
    %c0_i32_0 = arith.constant 0 : i32
    %c0_i32_1 = arith.constant 0 : i32
    return %c0_i32, %c0_i32_0 : i32, i32
  }
  func.func @transform_7(%arg0: i32) -> (i32, i32) {
    %c0_i32 = arith.constant 0 : i32
    %c0_i32_0 = arith.constant 0 : i32
    return %arg0, %c0_i32 : i32, i32
  }
}

</mosaic_0001>

<bundles_post_ra>
// kernel: tpu_custom_call.1
= control target key start
LH: loop header
LB: loop body
LE: loop exit
PB: predicated region body
PF: predicated region fallthrough
CT: control target
= control target key end

     0   :  { %12 = vsyncpa [#allocation3], 0  ;;  %s565_s27 = smov [#allocation2]   ;;  %s566_s29 = smov 64   ;;  %s658_s0 = inlined_call_operand.vmem [shape: f32[8,32], index: 0, kind: input, shape index: {}]   ;;  %s659_s1 = inlined_call_operand.vmem [shape: bf16[32,64], index: 1, kind: input, shape index: {}]   ;;  %s660_s2 = inlined_call_operand.vmem [shape: f32[1,64], index: 2, kind: input, shape index: {}]   ;;  %s661_s3 = inlined_call_operand.hbm [shape: bf16[4,64,64], index: 3, kind: input, shape index: {}]   ;;  %s662_s4 = inlined_call_operand.vmem [shape: f32[4,1,64], index: 4, kind: input, shape index: {}]   ;;  %s663_s5 = inlined_call_operand.vmem [shape: bf16[64,4], index: 5, kind: input, shape index: {}]   ;;  %s664_s6 = inlined_call_operand.vmem [shape: f32[1,4], index: 6, kind: input, shape index: {}]   ;;  %s665_s7 = inlined_call_operand.vmem [shape: f32[8,4], index: 7, kind: output, shape index: {}]  }
   0x1   :  { %s23_s26 = sshll.u32 %s661_s3, 4  ;;  %s25_s28 = sshll.u32 %s565_s27, 4  ;;  %s24_s26 = int_to_ptr.hbm [resolvable:$true] %s23_s26  ;;  %s26_s28 = int_to_ptr.vmem [resolvable:$true] %s25_s28 }
   0x2   :  { %s567_s30 = smov 4  }
   0x3   :  { %31 = dma.hbm_to_vmem [thread:$0]  %s24_s26, 2048, %s26_s28, [#allocation3], %s566_s29, %s566_s29, %s567_s30  }
   0x4   :  { %563 = dma.done.wait [#allocation3], 2048  }
   0x5   :  { %564 = vsyncadd [#allocation3], 4294965248  ;;  %v499_v0 = vld [vmem:[%s659_s1 + $0x8] sm:$0xff]  ;;  %v498_v1 = vld [vmem:[%s659_s1] sm:$0xff]  ;;  %vm65_vm0 = vcmask 261120   ;;  %vm126_vm2 = vcmask 523264  }
   0x6   :  { %v43_v2 = vld [vmem:[%s658_s0] sm:$0xff]  ;;  %75 = vmatpush.bf16.msra.mxu0 %v499_v0  ;;  %v503_v4 = vld [vmem:[#allocation2 + $0x18] sm:$0xff]  ;;  %v502_v5 = vld [vmem:[#allocation2 + $0x10] sm:$0xff]  ;;  %vm389_vm7 = vcmask 31744  }
   0x7   :  { %v44_v3 = vpack.c.bf16 %v43_v2, %v43_v2  ;;  %134 = vmatpush.bf16.msra.mxu1 %v503_v4  ;;  %v501_v6 = vld [vmem:[#allocation2 + $0x8] sm:$0xff]  ;;  %v500_v7 = vld [vmem:[#allocation2] sm:$0xff]  ;;  %v507_v19 = vld [vmem:[#allocation2 + $0x38] sm:$0xff] }
   0x8   :  { %v523_v8 = vld [vmem:[%s660_s2] ss:$0 sm:$0xff]  ;;  %196 = vmatpush.bf16.msra.mxu2 %v507_v19  ;;  %v506_v20 = vld [vmem:[#allocation2 + $0x30] sm:$0xff]  ;;  %v505_v21 = vld [vmem:[#allocation2 + $0x28] sm:$0xff] }
   0x9   :  { %v504_v22 = vld [vmem:[#allocation2 + $0x20] sm:$0xff]  ;;  %v511_v34 = vld [vmem:[#allocation2 + $0x58] sm:$0xff]  ;;  %v510_v35 = vld [vmem:[#allocation2 + $0x50] sm:$0xff] }
   0xa   :  { %76 = vmatpush.bf16.msra.mxu0 %v498_v1  ;;  %v524_v23 = vld [vmem:[%s662_s4] ss:$0 sm:$0xff]  ;;  %258 = vmatpush.bf16.msra.mxu3 %v511_v34  ;;  %v509_v36 = vld [vmem:[#allocation2 + $0x48] sm:$0xff]  ;;  %v525_v38 = vld [vmem:[%s662_s4 + $0x1] ss:$0 sm:$0xff] }
   0xb   :  { %135 = vmatpush.bf16.msra.mxu1 %v502_v5  ;;  %v508_v37 = vld [vmem:[#allocation2 + $0x40] sm:$0xff]  ;;  %v515_v49 = vld [vmem:[#allocation2 + $0x78] sm:$0xff]  ;;  %v514_v50 = vld [vmem:[#allocation2 + $0x70] sm:$0xff] }
   0xc   :  { %197 = vmatpush.bf16.msra.mxu2 %v506_v20  ;;  %v513_v51 = vld [vmem:[#allocation2 + $0x68] sm:$0xff]  ;;  %v512_v52 = vld [vmem:[#allocation2 + $0x60] sm:$0xff]  ;;  %v519_v0 = vld [vmem:[%s663_s5 + $0x18] sm:$0xff] }
   0xd   :  { %404 = vmatmul.msk.bf16.vlgmr.msra.gmra.mxu0 %vm65_vm0, %v44_v3  ;;  %v526_v53 = vld [vmem:[%s662_s4 + $0x2] ss:$0 sm:$0xff]  ;;  %v518_v1 = vld [vmem:[%s663_s5 + $0x10] sm:$0xff]  ;;  %v517_v2 = vld [vmem:[%s663_s5 + $0x8] sm:$0xff] }
   0xe   :  { %259 = vmatpush.bf16.msra.mxu3 %v510_v35  ;;  %320 = vmatpush.bf16.msrb.mxu0 %v515_v49  ;;  %v516_v3 = vld [vmem:[%s663_s5] sm:$0xff] }
   0xf   :  { %136 = vmatpush.bf16.msra.mxu1 %v501_v6  ;;  %v527_v4 = vld [vmem:[%s662_s4 + $0x3] ss:$0 sm:$0xff] }
  0x10   :  { %198 = vmatpush.bf16.msra.mxu2 %v505_v21 }
  0x12   :  { %260 = vmatpush.bf16.msra.mxu3 %v509_v36  ;;  %321 = vmatpush.bf16.msrb.mxu0 %v514_v50 }
  0x13   :  { %137 = vmatpush.bf16.msra.mxu1 %v500_v7 }
  0x14   :  { %199 = vmatpush.bf16.msra.mxu2 %v504_v22 }
  0x16   :  { %261 = vmatpush.bf16.msra.mxu3 %v508_v37  ;;  %322 = vmatpush.bf16.msrb.mxu0 %v513_v51 }
  0x17   :  { %380 = vmatpush.bf16.msrb.mxu1 %v519_v0 }
  0x1a   :  { %323 = vmatpush.bf16.msrb.mxu0 %v512_v52 }
  0x1b   :  { %381 = vmatpush.bf16.msrb.mxu1 %v518_v1 }
  0x1f   :  { %382 = vmatpush.bf16.msrb.mxu1 %v517_v2 }
  0x23   :  { %383 = vmatpush.bf16.msrb.mxu1 %v516_v3 }
  0x8a   :  { %v78_v9 = vpop.f32.mrf.mxu0 }
  0x8b   :  { %v79_v10 = vadd.f32 %v523_v8, %v78_v9 }
  0x8d   :  { %v83_v11 = vmul.f32 1.442695, %v79_v10  ;;  %vm82_vm1 = vcmp.gt.f32.partialorder %v79_v10, 0.0 }
  0x8f   :  { %529 = vpow2.f32 %v83_v11 }
  0x92   :  { %v80_v12 = vpop.f32.mrf.mxu0 }
  0x95   :  { %v530_v13 = vpop.eup %529 }
  0x96   :  { %v405_v14 = vadd.f32 -1.0, %v530_v13 }
  0x98   :  { %v86_v15 = vmul.f32 1.6732632, %v405_v14 }
  0x9a   :  { %v87_v16 = vsel %vm82_vm1, %v79_v10, %v86_v15  ;;  %v528_v15 = vld [vmem:[%s664_s6] ss:$0 sm:$0xff] }
  0x9b   :  { %v88_v17 = vmul.f32 1.050701, %v87_v16 }
  0x9d   :  { %v89_v18 = vpack.c.bf16 %v88_v17, %v88_v17 }
  0x9f   :  { %422 = vmatmul.msk.bf16.vlgmr.msra.gmra.mxu1 %vm126_vm2, %v89_v18 }
 0x11c   :  { %v139_v24 = vpop.f32.mrf.mxu1 }
 0x11d   :  { %v140_v25 = vadd.f32 %v524_v23, %v139_v24 }
 0x11f   :  { %v144_v26 = vmul.f32 1.442695, %v140_v25  ;;  %vm143_vm3 = vcmp.gt.f32.partialorder %v140_v25, 0.0 }
 0x121   :  { %531 = vpow2.f32 %v144_v26 }
 0x124   :  { %v141_v27 = vpop.f32.mrf.mxu1 }
 0x127   :  { %v532_v28 = vpop.eup %531 }
 0x128   :  { %v423_v29 = vadd.f32 -1.0, %v532_v28 }
 0x12a   :  { %v147_v30 = vmul.f32 1.6732632, %v423_v29 }
 0x12c   :  { %v148_v31 = vsel %vm143_vm3, %v140_v25, %v147_v30 }
 0x12d   :  { %v149_v32 = vmul.f32 1.050701, %v148_v31 }
 0x12f   :  { %v150_v33 = vpack.c.bf16 %v149_v32, %v149_v32 }
 0x131   :  { %441 = vmatmul.msk.bf16.vlgmr.msra.gmra.mxu2 %vm126_vm2, %v150_v33 }
 0x1b4   :  { %v201_v39 = vpop.f32.mrf.mxu2 }
 0x1b5   :  { %v202_v40 = vadd.f32 %v525_v38, %v201_v39 }
 0x1b7   :  { %v206_v41 = vmul.f32 1.442695, %v202_v40  ;;  %vm205_vm4 = vcmp.gt.f32.partialorder %v202_v40, 0.0 }
 0x1b9   :  { %533 = vpow2.f32 %v206_v41 }
 0x1bc   :  { %v203_v42 = vpop.f32.mrf.mxu2 }
 0x1bf   :  { %v534_v43 = vpop.eup %533 }
 0x1c0   :  { %v442_v44 = vadd.f32 -1.0, %v534_v43 }
 0x1c2   :  { %v209_v45 = vmul.f32 1.6732632, %v442_v44 }
 0x1c4   :  { %v210_v46 = vsel %vm205_vm4, %v202_v40, %v209_v45 }
 0x1c5   :  { %v211_v47 = vmul.f32 1.050701, %v210_v46 }
 0x1c7   :  { %v212_v48 = vpack.c.bf16 %v211_v47, %v211_v47 }
 0x1c9   :  { %460 = vmatmul.msk.bf16.vlgmr.msra.gmra.mxu3 %vm126_vm2, %v212_v48 }
 0x24c   :  { %v263_v54 = vpop.f32.mrf.mxu3 }
 0x24d   :  { %v264_v55 = vadd.f32 %v526_v53, %v263_v54 }
 0x24f   :  { %v268_v56 = vmul.f32 1.442695, %v264_v55  ;;  %vm267_vm5 = vcmp.gt.f32.partialorder %v264_v55, 0.0 }
 0x251   :  { %535 = vpow2.f32 %v268_v56 }
 0x254   :  { %v265_v57 = vpop.f32.mrf.mxu3 }
 0x257   :  { %v536_v58 = vpop.eup %535 }
 0x258   :  { %v461_v59 = vadd.f32 -1.0, %v536_v58 }
 0x25a   :  { %v271_v60 = vmul.f32 1.6732632, %v461_v59 }
 0x25c   :  { %v272_v61 = vsel %vm267_vm5, %v264_v55, %v271_v60 }
 0x25d   :  { %v273_v62 = vmul.f32 1.050701, %v272_v61 }
 0x25f   :  { %v274_v63 = vpack.c.bf16 %v273_v62, %v273_v62 }
 0x261   :  { %479 = vmatmul.msk.bf16.vlgmr.msrb.gmra.mxu0 %vm126_vm2, %v274_v63 }
 0x2de   :  { %v325_v5 = vpop.f32.mrf.mxu0 }
 0x2df   :  { %v326_v6 = vadd.f32 %v527_v4, %v325_v5 }
 0x2e1   :  { %v330_v7 = vmul.f32 1.442695, %v326_v6  ;;  %vm329_vm6 = vcmp.gt.f32.partialorder %v326_v6, 0.0 }
 0x2e3   :  { %537 = vpow2.f32 %v330_v7 }
 0x2e6   :  { %v327_v8 = vpop.f32.mrf.mxu0 }
 0x2e9   :  { %v538_v9 = vpop.eup %537 }
 0x2ea   :  { %v480_v10 = vadd.f32 -1.0, %v538_v9 }
 0x2ec   :  { %v333_v11 = vmul.f32 1.6732632, %v480_v10 }
 0x2ee   :  { %v334_v12 = vsel %vm329_vm6, %v326_v6, %v333_v11 }
 0x2ef   :  { %v335_v13 = vmul.f32 1.050701, %v334_v12 }
 0x2f1   :  { %v336_v14 = vpack.c.bf16 %v335_v13, %v335_v13 }
 0x2f3   :  { %497 = vmatmul.msk.bf16.vlgmr.msrb.gmra.mxu1 %vm126_vm2, %v336_v14 }
 0x370   :  { %v385_v16 = vpop.f32.mrf.mxu1 }
 0x371   :  { %v386_v17 = vadd.f32 %v528_v15, %v385_v16 }
 0x373   :  { %390 = vst.msk [vmem:[%s665_s7] sm:$0xff] %vm389_vm7, %v386_v17 }
 0x378   :  { %v387_v18 = vpop.f32.mrf.mxu1 }
 0x379   :  { %395 = vsyncpa [#allocation3], 1 }

</bundles_post_ra>
